<compile_context>
chip_gen: v7x
topology: tpu7x:2x2x1
jax: 0.10.0
libtpu: 0.0.40
codegen_flags: <defaults>
</compile_context>

<pallas_src>
import jax
import jax.numpy as jnp
from jax.experimental import pallas as pl
from jax.experimental.pallas import tpu as pltpu

_LANES = 128
_SINGLE_BLOCK_MAX_ROWS = 256   # below this, one ungridded block is cheapest


def _round_up(x, m):
    return ((x + m - 1) // m) * m


def _bce_logits_kernel(yhat_ref, y_ref, out_ref):
    # Cast in-kernel: DMA moves native-width data; exp/log1p run in f32.
    x = yhat_ref[...].astype(jnp.float32)
    y = y_ref[...].astype(jnp.float32)
    # Numerically stable BCE-with-logits.
    loss = jnp.maximum(x, 0.0) - x * y + jnp.log1p(jnp.exp(-jnp.abs(x)))
    out_ref[...] = loss.astype(out_ref.dtype)


def bce_with_logits_loss(yhat, y, *, max_row_tile=2048):
    """Elementwise nn.BCEWithLogitsLoss(reduction='none') via Pallas.

    Inputs are viewed as a lane-dense (rows, 128) slab (padded by at most 127
    elements when the total isn't a 128-multiple). Tiny problems run as a
    single block; larger problems stream row tiles of up to 2048x128 with a
    masked ragged final block and a >=2 (preferably even) grid so v7x's two
    TensorCores both get work.
    """
    orig_shape = yhat.shape
    out_dtype = yhat.dtype
    total = yhat.size

    yhat_flat = yhat.reshape(-1)
    y_flat = y.reshape(-1)

    rows = pl.cdiv(total, _LANES)
    padded_total = rows * _LANES
    if padded_total != total:
        # Only pad to the 128-lane boundary (<=127 elems); aligned case copies nothing.
        pad = padded_total - total
        yhat_flat = jnp.pad(yhat_flat, (0, pad))
        y_flat = jnp.pad(y_flat, (0, pad))

    yhat2 = yhat_flat.reshape(rows, _LANES)
    y2 = y_flat.reshape(rows, _LANES)

    if rows <= _SINGLE_BLOCK_MAX_ROWS:
        # Single block equal to the full array (exempt from (8,128) tiling rule).
        tr = rows
        grid = 1
    else:
        # At least 2 grid steps so the parallel axis shards across both v7x TCs.
        tr = min(max_row_tile, _round_up(pl.cdiv(rows, 2), 32))
        grid = pl.cdiv(rows, tr)
        if grid > 1 and grid % 2 == 1:
            # Prefer an even grid for a balanced two-core split.
            tr = _round_up(pl.cdiv(rows, grid + 1), 32)
            grid = pl.cdiv(rows, tr)

    n = padded_total
    bytes_per_elem = (jnp.dtype(yhat.dtype).itemsize
                      + jnp.dtype(y.dtype).itemsize
                      + jnp.dtype(out_dtype).itemsize)
    cost = pl.CostEstimate(flops=6 * n,
                           transcendentals=2 * n,
                           bytes_accessed=bytes_per_elem * n)

    out2 = pl.pallas_call(
        _bce_logits_kernel,
        out_shape=jax.ShapeDtypeStruct((rows, _LANES), out_dtype),
        grid=(grid,),
        in_specs=[
            pl.BlockSpec((tr, _LANES), lambda i: (i, 0)),
            pl.BlockSpec((tr, _LANES), lambda i: (i, 0)),
        ],
        out_specs=pl.BlockSpec((tr, _LANES), lambda i: (i, 0)),
        compiler_params=pltpu.CompilerParams(
            dimension_semantics=("parallel",)),
        cost_estimate=cost,
    )(yhat2, y2)

    out_flat = out2.reshape(-1)
    if padded_total != total:
        out_flat = out_flat[:total]
    return out_flat.reshape(orig_shape)


class BCELossWrapper:
    """JAX/Pallas port of the PyTorch BCELossWrapper (no learnable params)."""

    def __init__(self):
        self.last_loss = None

    def __call__(self, yhat, y, **kwargs):
        loss = bce_with_logits_loss(yhat, y)
        self.last_loss = {"expanded_loss": loss}
        return loss


if __name__ == "__main__":
    key = jax.random.PRNGKey(0)
    k1, k2 = jax.random.split(key)

    # NCHW, small shapes: batch=2, channels=4, spatial=16 (single-block path)
    yhat = jax.random.normal(k1, (2, 4, 16, 16), dtype=jnp.float32)
    y = (jax.random.uniform(k2, (2, 4, 16, 16)) > 0.5).astype(jnp.float32)

    wrapper = BCELossWrapper()
    loss = jax.block_until_ready(wrapper(yhat, y))

    ref = jnp.maximum(yhat, 0.0) - yhat * y + jnp.log1p(jnp.exp(-jnp.abs(yhat)))
    assert loss.shape == yhat.shape
    assert loss.dtype == yhat.dtype
    assert jnp.allclose(loss, ref, atol=1e-5, rtol=1e-5)

    # Exercise the tiled path + non-128-aligned tail + masked ragged last block.
    k3, k4 = jax.random.split(k1)
    yhat_b = jax.random.normal(k3, (3, 5, 50, 47), dtype=jnp.float32)
    y_b = (jax.random.uniform(k4, (3, 5, 50, 47)) > 0.5).astype(jnp.float32)
    loss_b = jax.block_until_ready(bce_with_logits_loss(yhat_b, y_b))
    ref_b = (jnp.maximum(yhat_b, 0.0) - yhat_b * y_b
             + jnp.log1p(jnp.exp(-jnp.abs(yhat_b))))
    assert loss_b.shape == yhat_b.shape
    assert jnp.allclose(loss_b, ref_b, atol=1e-5, rtol=1e-5)

    print("KERNEL_OK")
</pallas_src>

<mosaic_0001>
module attributes {stable_mosaic.version = 11 : i64} {
  func.func @_bce_logits_kernel(%arg0: i32, %arg1: memref<16x128xf32, #tpu.memory_space<vmem>>, %arg2: memref<16x128xf32, #tpu.memory_space<vmem>>, %arg3: memref<16x128xf32, #tpu.memory_space<vmem>>) attributes {dimension_semantics = [#tpu.dimension_semantics<parallel>], iteration_bounds = array<i64: 1>, scalar_prefetch = 0 : i64, scratch_operands = 0 : i64, tpu.core_type = #tpu.core_type<tc>, window_params = [{transform_indices = @transform_0, window_bounds = array<i64: 16, 128>}, {transform_indices = @transform_1, window_bounds = array<i64: 16, 128>}, {transform_indices = @transform_2, window_bounds = array<i64: 16, 128>}]} {
    %c0 = arith.constant 0 : index
    %c0_0 = arith.constant 0 : index
    %0 = vector.load %arg1[%c0, %c0_0] : memref<16x128xf32, #tpu.memory_space<vmem>>, vector<16x128xf32>
    %c0_1 = arith.constant 0 : index
    %c0_2 = arith.constant 0 : index
    %1 = vector.load %arg2[%c0_1, %c0_2] : memref<16x128xf32, #tpu.memory_space<vmem>>, vector<16x128xf32>
    %cst = arith.constant 0.000000e+00 : f32
    %2 = vector.broadcast %cst : f32 to vector<16x128xf32>
    %3 = arith.maximumf %0, %2 : vector<16x128xf32>
    %4 = arith.mulf %0, %1 : vector<16x128xf32>
    %5 = arith.subf %3, %4 : vector<16x128xf32>
    %6 = math.absf %0 : vector<16x128xf32>
    %cst_3 = arith.constant 0.000000e+00 : f32
    %7 = vector.broadcast %cst_3 : f32 to vector<16x128xf32>
    %8 = arith.subf %7, %6 : vector<16x128xf32>
    %9 = math.exp %8 : vector<16x128xf32>
    %10 = math.log1p %9 : vector<16x128xf32>
    %11 = arith.addf %5, %10 : vector<16x128xf32>
    %c0_4 = arith.constant 0 : index
    %c0_5 = arith.constant 0 : index
    %12 = vector.load %arg3[%c0_4, %c0_5] : memref<16x128xf32, #tpu.memory_space<vmem>>, vector<16x128xf32>
    tpu.vector_store %arg3[%c0_4, %c0_5], %11 {strides = array<i32>} : memref<16x128xf32, #tpu.memory_space<vmem>>, vector<16x128xf32>,
    return
  }
  func.func @transform_0(%arg0: i32) -> (i32, i32) {
    %c0_i32 = arith.constant 0 : i32
    %c0_i32_0 = arith.constant 0 : i32
    return %arg0, %c0_i32 : i32, i32
  }
  func.func @transform_1(%arg0: i32) -> (i32, i32) {
    %c0_i32 = arith.constant 0 : i32
    %c0_i32_0 = arith.constant 0 : i32
    return %arg0, %c0_i32 : i32, i32
  }
  func.func @transform_2(%arg0: i32) -> (i32, i32) {
    %c0_i32 = arith.constant 0 : i32
    %c0_i32_0 = arith.constant 0 : i32
    return %arg0, %c0_i32 : i32, i32
  }
}

</mosaic_0001>

<bundles_post_ra>
// kernel: tpu_custom_call.1
= control target key start
LH: loop header
LB: loop body
LE: loop exit
PB: predicated region body
PF: predicated region fallthrough
CT: control target
= control target key end

     0   :  { %7 = vsyncpa [#allocation3], 0  ;;  %s248_s0 = inlined_call_operand.hbm [shape: f32[16,128], index: 0, kind: input, shape index: {}]   ;;  %s249_s1 = inlined_call_operand.hbm [shape: f32[16,128], index: 1, kind: input, shape index: {}]   ;;  %s250_s2 = inlined_call_operand.hbm [shape: f32[16,128], index: 2, kind: output, shape index: {}]  }
   0x1   :  { %8 = vsyncpa [#allocation6], 0 }
   0x2   :  { %9 = vsyncpa [#allocation4], 0  ;;  %s183_s9 = smov [#allocation2]   ;;  %s111_s13 = scalar_lea.hbm %s248_s0, 256 }
   0x3   :  { %s15_s10 = sshll.u32 %s183_s9, 4  ;;  %p112_p0 = scmp.ne.s32.totalorder %s248_s0, %s111_s13  ;;  %s16_s10 = int_to_ptr.vmem [resolvable:$true] %s15_s10 }
   0x4   :  { %p115_p1 = scmp.lt.u32.totalorder %s111_s13, %s248_s0 }
   0x6   :  { %p117_p2 = pnand %p115_p1, %p112_p0 }
   0x8   :  { %120 = shalt.err (!%p117_p2)
}
   0x9   :  { %s121_s18 = scalar_lea.vmem %s16_s10, 256  ;;  %p126_p4 = scmp.lt.s32.totalorder %s16_s10, %s16_s10 }
   0xa   :  { %p122_p3 = scmp.ne.s32.totalorder %s16_s10, %s121_s18  ;;  %p127_p5 = scmp.lt.s32.totalorder %s121_s18, %s121_s18 }
   0xc   :  { %p128_p6 = por %p127_p5, %p126_p4 }
   0xe   :  { %p129_p7 = pnand %p128_p6, %p122_p3 }
  0x10   :  { %132 = shalt.err (!%p129_p7)
}
  0x11   :  { %s184_s19 = smov 128   ;;  %s185_s20 = smov 8  }
  0x12   :  { %21 = dma.hbm_to_vmem [thread:$0]  %s248_s0, 256, %s16_s10, [#allocation3], %s184_s19, %s184_s19, %s185_s20  }
  0x13   :  { %s186_s23 = smov [#allocation5]   ;;  %s133_s27 = scalar_lea.hbm %s249_s1, 256 }
  0x14   :  { %s27_s24 = sshll.u32 %s186_s23, 4  ;;  %p134_p8 = scmp.ne.s32.totalorder %s249_s1, %s133_s27  ;;  %s28_s24 = int_to_ptr.vmem [resolvable:$true] %s27_s24 }
  0x15   :  { %p137_p9 = scmp.lt.u32.totalorder %s133_s27, %s249_s1 }
  0x17   :  { %p139_p10 = pnand %p137_p9, %p134_p8 }
  0x19   :  { %142 = shalt.err (!%p139_p10)
}
  0x1a   :  { %s143_s4 = scalar_lea.vmem %s28_s24, 256  ;;  %p148_p12 = scmp.lt.s32.totalorder %s28_s24, %s28_s24 }
  0x1b   :  { %p144_p11 = scmp.ne.s32.totalorder %s28_s24, %s143_s4  ;;  %p149_p13 = scmp.lt.s32.totalorder %s143_s4, %s143_s4 }
  0x1d   :  { %p150_p0 = por %p149_p13, %p148_p12 }
  0x1f   :  { %p151_p1 = pnand %p150_p0, %p144_p11 }
  0x21   :  { %154 = shalt.err (!%p151_p1)
}
  0x22   :  { %33 = dma.hbm_to_vmem [thread:$0]  %s249_s1, 256, %s28_s24, [#allocation6], %s184_s19, %s184_s19, %s185_s20  }
  0x23   :  { %177 = dma.done.wait [#allocation3], 256  }
  0x24   :  { %178 = vsyncadd [#allocation3], 4294967040 }
  0x25   :  { %179 = dma.done.wait [#allocation6], 256  }
  0x26   :  { %180 = vsyncadd [#allocation6], 4294967040  ;;  %v40_v0 = vld [vmem:[#allocation2] sm:$0xff]  ;;  %v41_v1 = vld [vmem:[#allocation2 + $0x8] sm:$0xff]  ;;  %s187_s1 = smov [#allocation7]  }
  0x27   :  { %v50_v2 = vand.u32 2147483647, %v40_v0  ;;  %v51_v3 = vand.u32 2147483647, %v41_v1  ;;  %v42_v14 = vld [vmem:[#allocation5] sm:$0xff]  ;;  %v43_v15 = vld [vmem:[#allocation5 + $0x8] sm:$0xff] }
  0x28   :  { %v44_v17 = vmax.f32 %v40_v0, 0.0  ;;  %v46_v18 = vmul.f32 %v42_v14, %v40_v0  ;;  %v45_v21 = vmax.f32 %v41_v1, 0.0  ;;  %v47_v22 = vmul.f32 %v43_v15, %v41_v1  ;;  %s85_s6 = sshll.u32 %s187_s1, 4  ;;  %s86_s6 = int_to_ptr.vmem [resolvable:$true] %s85_s6 }
  0x29   :  { %v52_v4 = vsub.f32 0.0, %v50_v2  ;;  %v53_v5 = vsub.f32 0.0, %v51_v3  ;;  %s155_s7 = scalar_lea.vmem %s86_s6, 256  ;;  %p160_p3 = scmp.lt.s32.totalorder %s86_s6, %s86_s6 }
  0x2a   :  { %v48_v26 = vsub.f32 %v44_v17, %v46_v18  ;;  %v49_v30 = vsub.f32 %v45_v21, %v47_v22  ;;  %p156_p2 = scmp.ne.s32.totalorder %s86_s6, %s155_s7  ;;  %p161_p4 = scmp.lt.s32.totalorder %s155_s7, %s155_s7 }
  0x2b   :  { %v54_v6 = vmul.f32 1.442695, %v52_v4  ;;  %v56_v7 = vmul.f32 1.442695, %v53_v5 }
  0x2c   :  { %p162_p5 = por %p161_p4, %p160_p3 }
  0x2d   :  { %103 = vpow2.f32 %v54_v6 }
  0x2e   :  { %105 = vpow2.f32 %v56_v7  ;;  %p163_p6 = pnand %p162_p5, %p156_p2 }
  0x37   :  { %v104_v8 = vpop.eup %103 }
  0x38   :  { %v106_v9 = vpop.eup %105  ;;  %v58_v10 = vadd.f32 1.0, %v104_v8  ;;  %v61_v12 = vmul.f32 -0.5, %v104_v8  ;;  %v64_v19 = vand.u32 2147483647, %v104_v8 }
  0x39   :  { %v67_v11 = vadd.f32 1.0, %v106_v9  ;;  %v70_v13 = vmul.f32 -0.5, %v106_v9  ;;  %v73_v23 = vand.u32 2147483647, %v106_v9 }
  0x3a   :  { %107 = vlog2.f32 %v58_v10  ;;  %v62_v16 = vadd.f32 1.0, %v61_v12  ;;  %vm65_vm0 = vcmp.lt.f32.partialorder %v64_v19, 0.0004427343 }
  0x3b   :  { %109 = vlog2.f32 %v67_v11  ;;  %v71_v20 = vadd.f32 1.0, %v70_v13  ;;  %vm74_vm1 = vcmp.lt.f32.partialorder %v73_v23, 0.0004427343 }
  0x3c   :  { %v63_v24 = vmul.f32 %v104_v8, %v62_v16 }
  0x3d   :  { %v72_v27 = vmul.f32 %v106_v9, %v71_v20 }
  0x44   :  { %v108_v25 = vpop.eup %107 }
  0x45   :  { %v110_v28 = vpop.eup %109  ;;  %v60_v29 = vmul.f32 0.6931472, %v108_v25 }
  0x46   :  { %v69_v31 = vmul.f32 0.6931472, %v110_v28 }
  0x47   :  { %v66_v32 = vsel %vm65_vm0, %v63_v24, %v60_v29 }
  0x48   :  { %v76_v33 = vadd.f32 %v66_v32, %v48_v26  ;;  %v75_v34 = vsel %vm74_vm1, %v72_v27, %v69_v31 }
  0x49   :  { %v77_v35 = vadd.f32 %v75_v34, %v49_v30 }
  0x4a   :  { %78 = vst [vmem:[#allocation7] sm:$0xff] %v76_v33 }
  0x4b   :  { %79 = vst [vmem:[#allocation7 + $0x8] sm:$0xff] %v77_v35 }
  0x4c   :  { %166 = shalt.err (!%p163_p6)
}
  0x4d   :  { %s167_s10 = scalar_lea.hbm %s250_s2, 256 }
  0x4e   :  { %p168_p7 = scmp.ne.s32.totalorder %s250_s2, %s167_s10  ;;  %p171_p8 = scmp.lt.u32.totalorder %s167_s10, %s250_s2 }
  0x50   :  { %p173_p9 = pnand %p171_p8, %p168_p7 }
  0x52   :  { %176 = shalt.err (!%p173_p9)
}
  0x53   :  { %91 = dma.vmem_to_hbm [thread:$0]  %s86_s6, 256, %s250_s2, [#allocation4], %s184_s19, %s184_s19, %s185_s20  }
  0x54   :  { %181 = dma.done.wait [#allocation4], 256  }
  0x55   :  { %182 = vsyncadd [#allocation4], 4294967040 }
  0x56   :  { %95 = vsyncpa [#allocation3], 1 }
  0x57   :  { %96 = vsyncpa [#allocation6], 1 }
  0x58   :  { %97 = vsyncpa [#allocation4], 1 }

</bundles_post_ra>
